<compile_context>
chip_gen: v5e
topology: v5e:2x2
jax: 0.10.0
libtpu: 0.0.40
codegen_flags: <defaults>
</compile_context>

<pallas_src>
import numpy as np

import jax
import jax.numpy as jnp
from jax.experimental import pallas as pl
from jax.experimental.pallas import tpu as pltpu


# ----------------------------------------------------------------------------
# Anchor-line setup (host-side numpy glue — mirrors init_query_lines exactly)
# ----------------------------------------------------------------------------
def init_query_lines(num_anchors: int) -> np.ndarray:
    side = int(round(num_anchors ** 0.5))
    gy, gx = np.meshgrid(
        np.linspace(0.0, side - 1, side, dtype=np.float32),
        np.linspace(0.0, side - 1, side, dtype=np.float32),
        indexing="ij",
    )
    grid = np.concatenate([gx[..., None], gy[..., None]], axis=-1)  # (h, w, 2)=(x, y)
    grid = (grid + 0.5) / float(side)
    proposal = grid.reshape(-1, 2)
    keep = (0.05 < proposal[:, 1]) & (proposal[:, 1] < 0.95)
    return np.asarray(proposal[keep], dtype=np.float32)


def get_line_pts_from_normed_params(params, img_h, img_w):
    # TODO(synk): exact line parameterization is repo-specific (not provided);
    # use a deterministic (angle, offset) -> two-endpoint mapping of same shape.
    theta = params[..., 0] * jnp.pi
    cy = params[..., 1]
    cx = jnp.full_like(cy, 0.5)
    dx, dy = jnp.cos(theta), jnp.sin(theta)
    half = 0.5
    x1 = jnp.clip(cx - half * dx, 0.0, 1.0) * (img_w - 1)
    y1 = jnp.clip(cy - half * dy, 0.0, 1.0) * (img_h - 1)
    x2 = jnp.clip(cx + half * dx, 0.0, 1.0) * (img_w - 1)
    y2 = jnp.clip(cy + half * dy, 0.0, 1.0) * (img_h - 1)
    return jnp.stack([x1, y1, x2, y2], axis=-1)


def build_line_pool_matrix(pts, Hf, Wf, scale, num_samples=32):
    """Dense bilinear line-pooling matrix [N, Hf*Wf] (== grid_sample along line + mean).
    Built with numpy so the nonzero-tile structure is known host-side."""
    pts = np.asarray(pts, np.float32)
    N = pts.shape[0]
    t = np.linspace(0.0, 1.0, num_samples, dtype=np.float32)[None, :]
    x = np.clip((pts[:, 0:1] * (1 - t) + pts[:, 2:3] * t) / scale, 0.0, Wf - 1.0)
    y = np.clip((pts[:, 1:2] * (1 - t) + pts[:, 3:4] * t) / scale, 0.0, Hf - 1.0)
    x0 = np.floor(x)
    y0 = np.floor(y)
    x1 = np.minimum(x0 + 1, Wf - 1.0)
    y1 = np.minimum(y0 + 1, Hf - 1.0)
    wx1 = x - x0
    wx0 = 1.0 - wx1
    wy1 = y - y0
    wy0 = 1.0 - wy1
    M = np.zeros((N, Hf * Wf), np.float32)
    rows = np.repeat(np.arange(N), num_samples)

    def scatter(idx, w):
        np.add.at(M, (rows, idx.reshape(-1).astype(np.int64)), w.reshape(-1))

    scatter(y0 * Wf + x0, wy0 * wx0)
    scatter(y0 * Wf + x1, wy0 * wx1)
    scatter(y1 * Wf + x0, wy1 * wx0)
    scatter(y1 * Wf + x1, wy1 * wx1)
    return M / float(num_samples)


# ----------------------------------------------------------------------------
# Small helpers
# ----------------------------------------------------------------------------
def _pick_tile(total, target, mults=(256, 128, 16, 8)):
    """Largest divisor of `total` <= target that is a multiple of one of `mults`
    (tried in order); falls back to the full dim."""
    if total <= target:
        return total
    for m in mults:
        t = (target // m) * m
        while t >= m:
            if total % t == 0:
                return t
            t -= m
    return total


def _pick_anchor_tile(n_anchors, batch, target=256):
    """Anchor-tile size: divides N, multiple of 8, and (tile*batch) lane-aligned."""
    if n_anchors <= target:
        return n_anchors
    t = (target // 8) * 8
    while t >= 8:
        if n_anchors % t == 0 and (t * batch) % 128 == 0:
            return t
        t -= 8
    return n_anchors


def _nbytes(a):
    return int(np.prod(a.shape)) * a.dtype.itemsize


def _vmem_limit(est_bytes):
    """Per-generation VMEM budget: <= 75% of physical VMEM (v7x has 64 MiB/TC)."""
    cap = 128 << 20
    try:
        cap = int(getattr(pltpu.get_tpu_info(), "vmem_capacity_bytes", cap))
    except Exception:
        pass
    budget = (cap * 3) // 4
    return int(min(budget, max(16 << 20, est_bytes)))


# ----------------------------------------------------------------------------
# Pallas kernel A: patch-embedding "conv" as a row-tiled matmul.
# Output layout is (HW, B*C): batch packed on the lane axis (lane-dense, and
# exactly the layout the pooling matmul in detect() consumes).
# ----------------------------------------------------------------------------
def _patch_embed_kernel(x_ref, w_ref, b_ref, o_ref):
    B, TM, Kp = x_ref.shape
    C = w_ref.shape[1]
    # One stacked MXU matmul for all batches (leading-dim collapse is layout-free).
    y = (jnp.dot(x_ref[...].reshape(B * TM, Kp), w_ref[...],
                 preferred_element_type=jnp.float32) + b_ref[...])
    y = y.astype(o_ref.dtype)
    for b in range(B):                      # static, small: pack batch onto lanes
        o_ref[:, b * C:(b + 1) * C] = y[b * TM:(b + 1) * TM, :]


def patch_embed(x2d, w, b, *, row_tile=1024):
    """x2d: (B, HW, Kp) bf16 im2col patches; w: (Kp, C) bf16; b: (1, C) f32.
    Returns (HW, B*C) bf16."""
    B, HW, Kp = x2d.shape
    C = w.shape[1]
    TM = _pick_tile(HW, row_tile, mults=(256, 128, 16, 8))
    est = (2 * (B * TM * Kp * 2 + Kp * C * 2 + C * 4)     # double-buffered inputs
           + 2 * (TM * B * C * 2)                         # double-buffered output
           + B * TM * (Kp + C) * 4                        # in-kernel temporaries
           + (2 << 20))
    # TODO(synk): fold the NCHW patchify into this kernel's BlockSpec/index_map
    # (read the raw image directly) once the in-kernel (Cin,p,p) relayout lowers
    # well; that removes the remaining image-sized im2col HBM round trip.
    return pl.pallas_call(
        _patch_embed_kernel,
        out_shape=jax.ShapeDtypeStruct((HW, B * C), jnp.bfloat16),
        grid=(HW // TM,),
        in_specs=[
            pl.BlockSpec((B, TM, Kp), lambda i: (0, i, 0)),  # streamed patch rows
            pl.BlockSpec((Kp, C), lambda i: (0, 0)),         # embedding weight
            pl.BlockSpec((1, C), lambda i: (0, 0)),          # bias
        ],
        out_specs=pl.BlockSpec((TM, B * C), lambda i: (i, 0)),
        compiler_params=pltpu.CompilerParams(
            dimension_semantics=("parallel",),
            vmem_limit_bytes=_vmem_limit(est),
        ),
    )(x2d, w, b)


# ----------------------------------------------------------------------------
# Pallas kernel B: sparse-tiled line pooling (scalar-prefetched nonzero HW
# tiles) + LayerNorm + fused heads + softmax + anchor refinement, packed
# lane-dense output.  Grid = (anchor tiles [parallel], nonzero HW tiles [arb]).
# ----------------------------------------------------------------------------
def _detect_kernel(tid_ref, feat_ref, wpool_ref, gamma_ref, beta_ref,
                   w1t_ref, b1t_ref, w2t_ref, b2t_ref, p0t_ref,
                   out_ref, acc_ref):
    k = pl.program_id(1)                      # HW-tile reduction step

    @pl.when(k == 0)
    def _init():
        acc_ref[...] = jnp.zeros_like(acc_ref)

    # Single MXU call per HW tile: (TN, TK) x (TK, B*C) -> (TN, B*C) f32.
    acc_ref[...] += jnp.dot(wpool_ref[...], feat_ref[...],
                            preferred_element_type=jnp.float32)

    @pl.when(k == pl.num_programs(1) - 1)
    def _finalize():
        TN, BC = acc_ref.shape
        C = gamma_ref.shape[1]
        B = BC // C
        # Move the batch from lane groups to rows (static lane slices + concat),
        # giving (B*TN, C) rows that are proper channel vectors.
        xcat = jnp.concatenate(
            [acc_ref[:, b * C:(b + 1) * C] for b in range(B)], axis=0)

        # LayerNorm over channels (Line_Pooling_norm), f32.
        mu = jnp.mean(xcat, axis=-1, keepdims=True)
        var = jnp.mean(jnp.square(xcat - mu), axis=-1, keepdims=True)
        xn = (xcat - mu) * jax.lax.rsqrt(var + 1e-5)
        xn = xn * gamma_ref[...] + beta_ref[...]

        # Lane-dense layout for the heads: columns = (batch-major, anchor-minor).
        xT = jnp.transpose(xn).astype(jnp.bfloat16)                 # (C, B*TN)

        # Fused heads: layer 1 = concat(cls, reg) weights; layer 2 block-diagonal.
        h = (jnp.dot(w1t_ref[...], xT, preferred_element_type=jnp.float32)
             + b1t_ref[...])
        h = jnp.maximum(h, 0.0).astype(jnp.bfloat16)                # (2C, B*TN)
        out2 = (jnp.dot(w2t_ref[...], h, preferred_element_type=jnp.float32)
                + b2t_ref[...])                                     # (8, B*TN)

        logit_t = out2[0:2, :]                                      # class logits
        reg_t = out2[2:4, :]                                        # regression

        # Exact softmax over the two class rows (runs once per anchor tile).
        m = jnp.max(logit_t, axis=0, keepdims=True)
        e = jnp.exp(logit_t - m)
        prob_t = e / jnp.sum(e, axis=0, keepdims=True)

        params_t = p0t_ref[...] + reg_t                             # refined params

        # One lane-dense writeback: rows = [logit | prob | params | pad].
        out_ref[...] = jnp.concatenate(
            [logit_t, prob_t, params_t, jnp.zeros_like(logit_t)], axis=0)


def detect(feat, w_pool, p0t, params, *, tile_ids, hw_tile, anchor_tile):
    """feat: (HW, B*C) bf16; w_pool: (N, HW) bf16; p0t: (2, B*N) f32 in
    (anchor-tile, batch, anchor) column order; tile_ids: (n_nz,) int32 nonzero
    HW-tile indices.  Returns packed (8, B*N) f32: rows 0:2 logits, 2:4 probs,
    4:6 refined params (same column order as p0t)."""
    HW, BC = feat.shape
    N = w_pool.shape[0]
    C = params["gamma"].shape[1]
    B = BC // C
    TK = hw_tile
    TN = anchor_tile
    n_nz = int(tile_ids.shape[0])

    consts = [params["gamma"], params["beta"], params["w1t"], params["b1t"],
              params["w2t"], params["b2t"]]
    est = (2 * (TK * BC * 2 + TN * TK * 2)                 # streamed feat / w_pool tiles
           + 2 * (sum(_nbytes(a) for a in consts) + 2 * TN * B * 4)
           + 2 * (8 * TN * B * 4)                          # packed output tile
           + TN * BC * 4                                   # pooling accumulator
           + 8 * TN * B * C * 4                            # finalize temporaries
           + (2 << 20))
    # TODO(synk): constant operands below do not need double buffering
    # (pipeline_mode=pl.Buffered(1)); left default for lowering safety.
    full = lambda shape: pl.BlockSpec(shape, lambda i, k, tid: (0, 0))

    grid_spec = pltpu.PrefetchScalarGridSpec(
        num_scalar_prefetch=1,
        grid=(N // TN, n_nz),                # (anchor tiles ||, nonzero HW tiles)
        in_specs=[
            pl.BlockSpec((TK, BC), lambda i, k, tid: (tid[k], 0)),   # feature tile
            pl.BlockSpec((TN, TK), lambda i, k, tid: (i, tid[k])),   # pooling tile
            full((1, C)), full((1, C)),                              # LN gamma / beta
            full((2 * C, C)), full((2 * C, 1)),                      # fused head 1 (T)
            full((8, 2 * C)), full((8, 1)),                          # fused head 2 (T)
            pl.BlockSpec((2, TN * B), lambda i, k, tid: (0, i)),     # init params tile
        ],
        out_specs=pl.BlockSpec((8, TN * B), lambda i, k, tid: (0, i)),
        scratch_shapes=[pltpu.VMEM((TN, BC), jnp.float32)],          # pooling acc
    )
    return pl.pallas_call(
        _detect_kernel,
        out_shape=jax.ShapeDtypeStruct((8, B * N), jnp.float32),
        grid_spec=grid_spec,
        compiler_params=pltpu.CompilerParams(
            dimension_semantics=("parallel", "arbitrary"),
            vmem_limit_bytes=_vmem_limit(est),
        ),
    )(tile_ids, feat, w_pool,
      params["gamma"], params["beta"],
      params["w1t"], params["b1t"], params["w2t"], params["b2t"],
      p0t)


# ----------------------------------------------------------------------------
# Detector
# ----------------------------------------------------------------------------
class Cfg:
    def __init__(self, num_anchors, hidden_dim, topk, patch):
        self.num_anchors = num_anchors
        self.hidden_dim = hidden_dim
        self.topk = topk
        self.patch = patch


class Detector:
    def __init__(self, cfg: Cfg, img_h: int, img_w: int, in_channels: int):
        self.cfg = cfg
        self.img_h, self.img_w = img_h, img_w
        self.in_channels = in_channels
        self.patch = cfg.patch
        self.hidden = cfg.hidden_dim
        self.scale_factor = float(cfg.patch)           # feature_extractor stride
        self.Hf, self.Wf = img_h // cfg.patch, img_w // cfg.patch

        # anchors (exactly mirrors init_query_lines + pts derivation)
        self._init_params_np = init_query_lines(cfg.num_anchors)            # (N, 2)
        self.init_params = jnp.asarray(self._init_params_np)
        self.init_pts = get_line_pts_from_normed_params(
            self.init_params, img_h, img_w)                                 # (N, 4)
        wpool_np = build_line_pool_matrix(
            np.asarray(self.init_pts), self.Hf, self.Wf, self.scale_factor) # (N, HW)
        self.w_pool = jnp.asarray(wpool_np, dtype=jnp.bfloat16)

        # Pooling-matrix sparsity: each anchor line touches <= 4*num_samples
        # cells, so most HW tiles are empty at realistic sizes.  The kernel only
        # visits the nonzero tiles (scalar-prefetched tile-id list).
        HW = self.Hf * self.Wf
        self.hw_tile = _pick_tile(HW, 512, mults=(256, 128))
        n_tiles = HW // self.hw_tile
        nz = np.abs(wpool_np).reshape(-1, n_tiles, self.hw_tile).sum(axis=(0, 2)) > 0.0
        ids = np.nonzero(nz)[0].astype(np.int32)
        if ids.size == 0:
            ids = np.zeros((1,), np.int32)
        self.hw_tile_ids = jnp.asarray(ids)
        # TODO(synk): per-anchor-tile nonzero lists (or a gather-based pooling
        # kernel) would also skip the remaining all-zero (anchor, HW) tile pairs.

        # deterministic synthetic weights (bf16 for MXU operands, f32 elsewhere)
        k = jax.random.PRNGKey(42)
        ks = jax.random.split(k, 8)
        C = self.hidden
        Kp = in_channels * cfg.patch * cfg.patch
        s = 0.02
        self.w_embed = (jax.random.normal(ks[0], (Kp, C), jnp.float32) * s
                        ).astype(jnp.bfloat16)
        self.b_embed = jnp.zeros((1, C), jnp.float32)

        w1c = jax.random.normal(ks[1], (C, C), jnp.float32) * s
        w1r = jax.random.normal(ks[3], (C, C), jnp.float32) * s
        w2c = jax.random.normal(ks[2], (C, 2), jnp.float32) * s
        w2r = jax.random.normal(ks[4], (C, 2), jnp.float32) * s

        # Fused heads:
        #   layer-1: concat cls/reg weights -> transposed (2C, C)
        #   layer-2: block-diagonal, output dim padded 2+2 -> 8 sublanes
        w1t = jnp.concatenate([w1c, w1r], axis=1).T              # (2C, C)
        w2t = jnp.zeros((8, 2 * C), jnp.float32)
        w2t = w2t.at[0:2, 0:C].set(w2c.T)                        # cls branch
        w2t = w2t.at[2:4, C:2 * C].set(w2r.T)                    # reg branch
        self.params = {
            "gamma": jnp.ones((1, C), jnp.float32),
            "beta": jnp.zeros((1, C), jnp.float32),
            "w1t": w1t.astype(jnp.bfloat16),
            "b1t": jnp.zeros((2 * C, 1), jnp.float32),
            "w2t": w2t.astype(jnp.bfloat16),
            "b2t": jnp.zeros((8, 1), jnp.float32),
        }
        # TODO(synk): Post_Process / topk combination path (prepare_for_combination)
        # is not on the forward() path, so it is not implemented here.

    def forward(self, img):
        B, Cin, H, W = img.shape
        p = self.patch
        Hf, Wf = H // p, W // p
        HW = Hf * Wf
        N = self.init_params.shape[0]
        C = self.hidden

        # --- feature extraction (glue: patchify NCHW; Pallas: embed matmul) ---
        x = img.reshape(B, Cin, Hf, p, Wf, p)
        x = x.transpose(0, 2, 4, 1, 3, 5).reshape(B, HW, Cin * p * p)
        feat = patch_embed(x.astype(jnp.bfloat16), self.w_embed, self.b_embed)
        # feat: (HW, B*C) bf16, lane-dense, batch packed on lanes.
        # (img_pos from the original Feature_Extractor is unused downstream)

        # --- semantic line detection (single fused Pallas kernel) ---
        TN = _pick_anchor_tile(N, B)
        NT = N // TN
        # Init params in the kernel's packed column order: (anchor-tile, batch, anchor).
        p0 = np.broadcast_to(self._init_params_np.reshape(NT, 1, TN, 2),
                             (NT, B, TN, 2)).reshape(NT * B * TN, 2)
        p0t = jnp.asarray(np.ascontiguousarray(p0.T))                  # (2, B*N)

        packed = detect(feat, self.w_pool, p0t, self.params,
                        tile_ids=self.hw_tile_ids, hw_tile=self.hw_tile,
                        anchor_tile=TN)                                # (8, B*N)
        pk = packed.reshape(8, NT, B, TN)
        unpack = lambda a: jnp.transpose(a, (2, 1, 3, 0)).reshape(B, N, 2)
        cls = unpack(pk[0:2])
        prob = unpack(pk[2:4])
        new_params = unpack(pk[4:6])
        pts = get_line_pts_from_normed_params(new_params, H, W)

        return {
            "pts_init": jnp.broadcast_to(self.init_pts[None], (B, N, 4)),
            "params_init": jnp.broadcast_to(self.init_params[None], (B, N, 2)),
            "cls": cls,
            "prob": prob,
            "pts": pts,
            "params": new_params,
        }


# ----------------------------------------------------------------------------
# Pure-JAX reference (mirrors the kernel math, incl. bf16 cast points)
# ----------------------------------------------------------------------------
def reference_forward(det: Detector, img):
    B, Cin, H, W = img.shape
    p = det.patch
    Hf, Wf = H // p, W // p
    HW = Hf * Wf
    N = det.init_params.shape[0]
    C = det.hidden

    x = img.reshape(B, Cin, Hf, p, Wf, p).transpose(0, 2, 4, 1, 3, 5)
    x = x.reshape(B, HW, Cin * p * p).astype(jnp.bfloat16)
    feat = (jnp.einsum("bhk,kc->bhc", x, det.w_embed,
                       preferred_element_type=jnp.float32)
            + det.b_embed).astype(jnp.bfloat16)                        # (B, HW, C)

    pooled = jnp.einsum("nh,bhc->bnc", det.w_pool, feat,
                        preferred_element_type=jnp.float32)            # (B, N, C)
    mu = jnp.mean(pooled, -1, keepdims=True)
    var = jnp.mean(jnp.square(pooled - mu), -1, keepdims=True)
    xn = (pooled - mu) * jax.lax.rsqrt(var + 1e-5)
    xn = xn * det.params["gamma"] + det.params["beta"]
    xf = xn.reshape(B * N, C).astype(jnp.bfloat16)

    h = jnp.maximum(
        jnp.dot(xf, det.params["w1t"].T, preferred_element_type=jnp.float32)
        + det.params["b1t"].T, 0.0).astype(jnp.bfloat16)               # (B*N, 2C)
    out2 = (jnp.dot(h, det.params["w2t"].T, preferred_element_type=jnp.float32)
            + det.params["b2t"].T)                                     # (B*N, 8)
    logit = out2[:, 0:2].reshape(B, N, 2)
    reg = out2[:, 2:4].reshape(B, N, 2)
    prob = jax.nn.softmax(logit, axis=-1)
    new_params = det.init_params[None] + reg
    return {"cls": logit, "prob": prob, "params": new_params}


def _run_and_check(det: Detector, img, atol=2e-2):
    out = det.forward(img)
    out = jax.tree_util.tree_map(jax.block_until_ready, out)
    B = img.shape[0]
    N = det.init_params.shape[0]
    assert out["cls"].shape == (B, N, 2)
    assert out["prob"].shape == (B, N, 2)
    assert out["params"].shape == (B, N, 2)
    assert out["pts"].shape == (B, N, 4)
    assert np.allclose(np.asarray(jnp.sum(out["prob"], -1)), 1.0, atol=1e-3)
    ref = reference_forward(det, img)
    for name in ("cls", "prob", "params"):
        assert np.allclose(np.asarray(out[name]), np.asarray(ref[name]),
                           atol=atol), name
    return out


# ----------------------------------------------------------------------------
if __name__ == "__main__":
    key = jax.random.PRNGKey(0)
    k1, k2 = jax.random.split(key)

    # Small demo config (shapes consistent with the module).
    B, Cin, H, W = 2, 3, 32, 32
    img = jax.random.normal(k1, (B, Cin, H, W), jnp.float32)
    det = Detector(Cfg(num_anchors=16, hidden_dim=32, topk=3, patch=8),
                   img_h=H, img_w=W, in_channels=Cin)
    _run_and_check(det, img)

    # Larger config: exercises the multi-tile HW reduction, the sparse HW-tile
    # skip and the anchor-parallel grid axis (layout / accumulation coverage).
    B2, H2, W2 = 2, 256, 256
    img2 = jax.random.normal(k2, (B2, Cin, H2, W2), jnp.float32)
    det2 = Detector(Cfg(num_anchors=1024, hidden_dim=32, topk=3, patch=8),
                    img_h=H2, img_w=W2, in_channels=Cin)
    _run_and_check(det2, img2)

    print("KERNEL_OK")
</pallas_src>

<mosaic_0001>
module attributes {stable_mosaic.version = 11 : i64} {
  func.func @_patch_embed_kernel(%arg0: i32, %arg1: memref<2x16x192xbf16, #tpu.memory_space<vmem>>, %arg2: memref<192x32xbf16, #tpu.memory_space<vmem>>, %arg3: memref<1x32xf32, #tpu.memory_space<vmem>>, %arg4: memref<16x64xbf16, #tpu.memory_space<vmem>>) attributes {dimension_semantics = [#tpu.dimension_semantics<parallel>], iteration_bounds = array<i64: 1>, scalar_prefetch = 0 : i64, scratch_operands = 0 : i64, tpu.core_type = #tpu.core_type<tc>, window_params = [{transform_indices = @transform_0, window_bounds = array<i64: 2, 16, 192>}, {pipeline_mode = #tpu.pipeline_mode<synchronous>, transform_indices = @transform_1, window_bounds = array<i64: 192, 32>}, {pipeline_mode = #tpu.pipeline_mode<synchronous>, transform_indices = @transform_2, window_bounds = array<i64: 1, 32>}, {transform_indices = @transform_3, window_bounds = array<i64: 16, 64>}]} {
    %c0 = arith.constant 0 : index
    %c0_0 = arith.constant 0 : index
    %c0_1 = arith.constant 0 : index
    %0 = vector.load %arg1[%c0, %c0_0, %c0_1] : memref<2x16x192xbf16, #tpu.memory_space<vmem>>, vector<2x16x192xbf16>
    %1 = vector.shape_cast %0 : vector<2x16x192xbf16> to vector<32x192xbf16>
    %c0_2 = arith.constant 0 : index
    %c0_3 = arith.constant 0 : index
    %2 = vector.load %arg2[%c0_2, %c0_3] : memref<192x32xbf16, #tpu.memory_space<vmem>>, vector<192x32xbf16>
    %cst = arith.constant dense<0.000000e+00> : vector<32x32xf32>
    %3 = tpu.matmul %1, %2, %cst {dimension_numbers = #tpu.dot_dimension_numbers<[1], [0], [0], [1], [0, 0, 1, 1], [], []>} : vector<32x192xbf16>, vector<192x32xbf16>, vector<32x32xf32> -> vector<32x32xf32>
    %c0_4 = arith.constant 0 : index
    %c0_5 = arith.constant 0 : index
    %4 = vector.load %arg3[%c0_4, %c0_5] : memref<1x32xf32, #tpu.memory_space<vmem>>, vector<1x32xf32>
    %5 = vector.broadcast %4 : vector<1x32xf32> to vector<32x32xf32>
    %6 = arith.addf %3, %5 : vector<32x32xf32>
    %7 = arith.truncf %6 : vector<32x32xf32> to vector<32x32xbf16>
    %8 = vector.extract_strided_slice %7 {offsets = [0, 0], sizes = [16, 32], strides = [1, 1]} : vector<32x32xbf16> to vector<16x32xbf16>
    %c0_6 = arith.constant 0 : index
    %c0_7 = arith.constant 0 : index
    %9 = vector.load %arg4[%c0_6, %c0_7] : memref<16x64xbf16, #tpu.memory_space<vmem>>, vector<16x32xbf16>
    tpu.vector_store %arg4[%c0_6, %c0_7], %8 {strides = array<i32>} : memref<16x64xbf16, #tpu.memory_space<vmem>>, vector<16x32xbf16>,
    %10 = vector.extract_strided_slice %7 {offsets = [16, 0], sizes = [16, 32], strides = [1, 1]} : vector<32x32xbf16> to vector<16x32xbf16>
    %c0_8 = arith.constant 0 : index
    %c32 = arith.constant 32 : index
    %11 = vector.load %arg4[%c0_8, %c32] : memref<16x64xbf16, #tpu.memory_space<vmem>>, vector<16x32xbf16>
    tpu.vector_store %arg4[%c0_8, %c32], %10 {strides = array<i32>} : memref<16x64xbf16, #tpu.memory_space<vmem>>, vector<16x32xbf16>,
    return
  }
  func.func @transform_0(%arg0: i32) -> (i32, i32, i32) {
    %c0_i32 = arith.constant 0 : i32
    %c0_i32_0 = arith.constant 0 : i32
    %c0_i32_1 = arith.constant 0 : i32
    return %c0_i32, %arg0, %c0_i32_0 : i32, i32, i32
  }
  func.func @transform_1(%arg0: i32) -> (i32, i32) {
    %c0_i32 = arith.constant 0 : i32
    %c0_i32_0 = arith.constant 0 : i32
    %c0_i32_1 = arith.constant 0 : i32
    return %c0_i32, %c0_i32_0 : i32, i32
  }
  func.func @transform_2(%arg0: i32) -> (i32, i32) {
    %c0_i32 = arith.constant 0 : i32
    %c0_i32_0 = arith.constant 0 : i32
    %c0_i32_1 = arith.constant 0 : i32
    return %c0_i32, %c0_i32_0 : i32, i32
  }
  func.func @transform_3(%arg0: i32) -> (i32, i32) {
    %c0_i32 = arith.constant 0 : i32
    %c0_i32_0 = arith.constant 0 : i32
    return %arg0, %c0_i32 : i32, i32
  }
}

</mosaic_0001>

<bundles_post_ra>
// kernel: tpu_custom_call.1
= control target key start
LH: loop header
LB: loop body
LE: loop exit
PB: predicated region body
PF: predicated region fallthrough
CT: control target
= control target key end

     0   :  { %s432_s0 = inlined_call_operand.vmem [shape: bf16[2,16,192], index: 0, kind: input, shape index: {}]   ;;  %s433_s1 = inlined_call_operand.vmem [shape: bf16[192,32], index: 1, kind: input, shape index: {}]   ;;  %s434_s2 = inlined_call_operand.vmem [shape: f32[1,32], index: 2, kind: input, shape index: {}]   ;;  %s435_s3 = inlined_call_operand.hbm [shape: bf16[16,64], index: 3, kind: output, shape index: {}]  }
   0x1   :  { %v296_v0 = vld [vmem:[%s433_s1 + $0x38] sm:$0xff]  ;;  %v295_v2 = vld [vmem:[%s433_s1 + $0x30] sm:$0xff]  ;;  %v294_v4 = vld [vmem:[%s433_s1 + $0x28] sm:$0xff] }
   0x2   :  { %v300_v1 = vld [vmem:[%s433_s1 + $0x58] sm:$0xff]  ;;  %145 = vmatpush.bf16.msra.mxu0 %v296_v0  ;;  %301 = vmatpush.bf16.msra.mxu2 %v296_v0  ;;  %v299_v3 = vld [vmem:[%s433_s1 + $0x50] sm:$0xff]  ;;  %v298_v5 = vld [vmem:[%s433_s1 + $0x48] sm:$0xff] }
   0x3   :  { %168 = vmatpush.bf16.msra.mxu1 %v300_v1 }
   0x6   :  { %146 = vmatpush.bf16.msra.mxu0 %v295_v2  ;;  %302 = vmatpush.bf16.msra.mxu2 %v295_v2 }
   0x7   :  { %169 = vmatpush.bf16.msra.mxu1 %v299_v3 }
   0x8   :  { %8 = vsyncpa [#allocation3], 0  ;;  %v293_v6 = vld [vmem:[%s433_s1 + $0x20] sm:$0xff]  ;;  %v223_v9 = vld [vmem:[%s432_s0 + $0x8] sm:$0xf0]  ;;  %vm138_vm0 = vcmask 523264  }
   0x9   :  { %v297_v7 = vld [vmem:[%s433_s1 + $0x40] sm:$0xff]  ;;  %v292_v11 = vld [vmem:[%s433_s1 + $0x18] sm:$0xff]  ;;  %v291_v12 = vld [vmem:[%s433_s1 + $0x10] sm:$0xff]  ;;  %vm187_vm1 = vcmask 257024   ;;  %vm198_vm2 = vcmask 519424   ;;  %s207_s29 = sshll.u32 %s435_s3, 4  ;;  %s208_s29 = int_to_ptr.hbm [resolvable:$true] %s207_s29 }
   0xa   :  { %147 = vmatpush.bf16.msra.mxu0 %v294_v4  ;;  %303 = vmatpush.bf16.msra.mxu2 %v294_v4  ;;  %v285_v8 = vld [vmem:[%s432_s0 + $0x4] sm:$0xf]  ;;  %v290_v13 = vld [vmem:[%s433_s1 + $0x8] sm:$0xff]  ;;  %v221_v15 = vld [vmem:[%s432_s0] sm:$0xf]  ;;  %s342_s30 = smov 64  }
   0xb   :  { %170 = vmatpush.bf16.msra.mxu1 %v298_v5  ;;  %v226_v10 = vor.u32 %v285_v8, %v223_v9  ;;  %v289_v14 = vld [vmem:[%s433_s1] sm:$0xff]  ;;  %v286_v16 = vld [vmem:[%s432_s0 + $0x4] sm:$0xf0]  ;;  %v229_v17 = vld [vmem:[%s432_s0 + $0x10] sm:$0xf]  ;;  %s343_s4 = smov 4  }
   0xc   :  { %v288_v18 = vld [vmem:[%s432_s0 + $0x14] sm:$0xf0]  ;;  %v287_v19 = vld [vmem:[%s432_s0 + $0x14] sm:$0xf]  ;;  %v231_v20 = vld [vmem:[%s432_s0 + $0x18] sm:$0xf0]  ;;  %v222_v21 = vor.u32 %v286_v16, %v221_v15 }
   0xd   :  { %v230_v22 = vor.u32 %v288_v18, %v229_v17  ;;  %v234_v23 = vor.u32 %v287_v19, %v231_v20  ;;  %v313_v26 = vld [vmem:[%s434_s2] ss:$0 sm:$0xff]  ;;  %s340_s0 = smov 32   ;;  %s341_s2 = smov [#allocation2]  }
   0xe   :  { %148 = vmatpush.bf16.msra.mxu0 %v293_v6  ;;  %304 = vmatpush.bf16.msra.mxu2 %v293_v6  ;;  %s205_s26 = sshll.u32 %s341_s2, 4  ;;  %s206_s26 = int_to_ptr.vmem [resolvable:$true] %s205_s26 }
   0xf   :  { %171 = vmatpush.bf16.msra.mxu1 %v297_v7 }
  0x12   :  { %283 = vmatmul.msk.bf16.vlgmr.msra.gmra.mxu1 %vm138_vm0, %v226_v10  ;;  %149 = vmatpush.bf16.msra.mxu0 %v292_v11 }
  0x13   :  { %305 = vmatpush.bf16.msra.mxu2 %v292_v11 }
  0x16   :  { %150 = vmatpush.bf16.msra.mxu0 %v291_v12 }
  0x17   :  { %306 = vmatpush.bf16.msra.mxu2 %v291_v12 }
  0x1a   :  { %151 = vmatpush.bf16.msra.mxu0 %v290_v13 }
  0x1b   :  { %307 = vmatpush.bf16.msra.mxu2 %v290_v13 }
  0x1e   :  { %152 = vmatpush.bf16.msra.mxu0 %v289_v14 }
  0x1f   :  { %308 = vmatpush.bf16.msra.mxu2 %v289_v14 }
  0x21   :  { %153 = vmatmul.bf16.vlgmr.msra.gmra.mxu0 %v222_v21 }
  0x22   :  { %158 = vmatmul.bf16.vlgmr.msra.gmra.mxu2 %v230_v22  ;;  %284 = vmatmul.msk.bf16.gmra.mxu1 %vm138_vm0, %v234_v23 }
  0x8f   :  { %v173_v24 = vpop.f32.mrf.mxu1 }
  0x97   :  { %v175_v25 = vpop.f32.mrf.mxu1 }
  0x9e   :  { %v154_v27 = vpop.f32.mrf.mxu0 }
  0x9f   :  { %v155_v28 = vadd.f32 %v313_v26, %v154_v27  ;;  %v178_v31 = vpop.f32.mrf.mxu1 }
  0xa1   :  { %v174_v29 = vadd.f32 %v173_v24, %v155_v28 }
  0xa3   :  { %v183_v30 = vpack.c.bf16 %v174_v29, %v174_v29 }
  0xa5   :  { %v159_v32 = vpop.f32.mrf.mxu2  ;;  %188 = vst.msk [vmem:[#allocation2] sm:$0xf] %vm187_vm1, %v183_v30 }
  0xa6   :  { %v160_v33 = vadd.f32 %v313_v26, %v159_v32  ;;  %v156_v34 = vpop.f32.mrf.mxu0 }
  0xa7   :  { %v157_v35 = vadd.f32 %v313_v26, %v156_v34  ;;  %v180_v42 = vpop.f32.mrf.mxu1 }
  0xa8   :  { %v179_v36 = vadd.f32 %v178_v31, %v160_v33 }
  0xa9   :  { %v176_v37 = vadd.f32 %v175_v25, %v157_v35 }
  0xaa   :  { %v185_v38 = vpack.c.bf16 %v179_v36, %v179_v36 }
  0xab   :  { %v184_v39 = vpack.c.bf16 %v176_v37, %v176_v37 }
  0xac   :  { %192 = vrot.lane.b32.xlu0 %v185_v38, %s340_s0 }
  0xad   :  { %v161_v40 = vpop.f32.mrf.mxu2  ;;  %189 = vst.msk [vmem:[#allocation2 + $0x4] sm:$0xf] %vm187_vm1, %v184_v39 }
  0xae   :  { %v162_v41 = vadd.f32 %v313_v26, %v161_v40 }
  0xb0   :  { %v181_v43 = vadd.f32 %v180_v42, %v162_v41 }
  0xb2   :  { %v186_v44 = vpack.c.bf16 %v181_v43, %v181_v43 }
  0xb4   :  { %194 = vrot.lane.b32.xlu0 %v186_v44, %s340_s0 }
 0x11e   :  { %v193_v45 = vpop.permute.xlu0 %192 }
 0x11f   :  { %199 = vst.msk [vmem:[#allocation2] sm:$0xf] %vm198_vm2, %v193_v45 }
 0x126   :  { %v195_v46 = vpop.permute.xlu0 %194 }
 0x127   :  { %200 = vst.msk [vmem:[#allocation2 + $0x4] sm:$0xf] %vm198_vm2, %v195_v46 }
 0x128   :  { %213 = dma.vmem_to_hbm [thread:$0]  %s206_s26, 128, %s208_s29, [#allocation3], %s342_s30, %s342_s30, %s343_s4  }
 0x129   :  { %338 = dma.done.wait [#allocation3], 128  }
 0x12a   :  { %339 = vsyncadd [#allocation3], 4294967168 }
 0x12b   :  { %218 = vsyncpa [#allocation3], 1 }

</bundles_post_ra>
